<compile_context>
chip_gen: v6e
topology: v6e:2x2x1
jax: 0.10.0
libtpu: 0.0.40
codegen_flags: <defaults>
</compile_context>

<pallas_src>
import functools

import jax
import jax.numpy as jnp
from jax.experimental import pallas as pl
from jax.experimental.pallas import tpu as pltpu

# ---- Model hyper-parameters (small, consistent with DNN(num_inputs, hidden_size, ...)) ----
NUM_INPUTS = 16        # LPS bins per frame (257 in the original config)
HIDDEN = 32            # hidden_size (1024 in the original config)
NUM_LAYERS = 4         # num_layers
IN_FRAMES = 1          # in_frames (input context frames)
BATCH = 8              # batch of LPS frames
BN_EPS = 1e-5          # nn.BatchNorm1d default eps

LANE = 128
MAX_TILE_B = 512       # batch-tile rows per grid step (amortize ~0.35us/step overhead)


def _round_up(n, m):
    return ((n + m - 1) // m) * m


D_IN = NUM_INPUTS * IN_FRAMES
D_IN_PAD = _round_up(D_IN, LANE)          # lane-pad input features
H_PAD = _round_up(HIDDEN, LANE)           # lane-pad hidden width
D_OUT_PAD = _round_up(NUM_INPUTS, LANE)   # lane-pad output features (lane-dense stores)


def dnn_kernel(x_ref, w0_ref, wh_ref, b_ref, a_ref, g_ref, be_ref,
               wo_ref, bo_ref, o_ref, *, tb, b_total, needs_mask):
    """num_layers x (Linear -> PReLU -> BatchNorm1d) -> out Linear, on one batch tile.

    BatchNorm1d uses batch statistics (training-mode forward, biased variance),
    computed over the valid rows of this tile in a single fused pass
    (sum / sum-of-squares -> scale & shift folded with gamma/beta).
    Dropout is p=0.0 in the reference config, hence not even constructed -> no-op.
    NOTE: if the batch is split over several grid tiles (or megacore cores) the
    statistics are per-tile; the example below runs in a single tile, matching
    PyTorch whole-batch statistics exactly.
    """
    if needs_mask:
        # Only needed when the last tile holds fewer than `tb` valid rows.
        i = pl.program_id(0)
        rows = jax.lax.broadcasted_iota(jnp.int32, (tb, 1), 0)
        n_valid = jnp.minimum(tb, b_total - i * tb)
        mask = (rows < n_valid).astype(jnp.float32)           # [tb, 1]
        inv_n = 1.0 / n_valid.astype(jnp.float32)
    else:
        inv_n = 1.0 / float(tb)

    # Per-layer vector params: load each ref once; static slices below are free.
    b_all = b_ref[...]                                        # [NL, H_PAD] f32
    a_all = a_ref[...]
    g_all = g_ref[...]
    be_all = be_ref[...]

    h = x_ref[...]                                            # bf16 [tb, D_IN_PAD]

    for nl in range(NUM_LAYERS):                              # statically unrolled
        w = w0_ref[...] if nl == 0 else wh_ref[nl - 1]        # bf16 [K, H_PAD]
        bias = b_all[nl:nl + 1, :]
        alpha = a_all[nl:nl + 1, :]
        gamma = g_all[nl:nl + 1, :]
        beta = be_all[nl:nl + 1, :]

        # ----- fc_nl : Linear (bf16 MXU inputs, f32 accumulate) -----
        lhs = h if nl == 0 else h.astype(jnp.bfloat16)
        h = jnp.dot(lhs, w, preferred_element_type=jnp.float32) + bias

        # ----- prelu_nl : PReLU(HIDDEN), per-channel alpha (f32 VPU) -----
        h = jnp.maximum(h, 0.0) + alpha * jnp.minimum(h, 0.0)

        # ----- bn_nl : BatchNorm1d(HIDDEN), single-pass (masked) batch stats -----
        if needs_mask:
            hm = h * mask
            s1 = jnp.sum(hm, axis=0, keepdims=True)           # sum(h) over valid rows
            s2 = jnp.sum(hm * h, axis=0, keepdims=True)       # sum(h^2)
        else:
            s1 = jnp.sum(h, axis=0, keepdims=True)
            s2 = jnp.sum(h * h, axis=0, keepdims=True)
        mean = s1 * inv_n
        var = jnp.maximum(s2 * inv_n - mean * mean, 0.0)      # biased variance
        scale = gamma * jax.lax.rsqrt(var + BN_EPS)
        shift = beta - mean * scale
        h = h * scale + shift

        # dout_nl : Dropout(p=0.0) -> identity

    # ----- out_fc : Linear(HIDDEN -> NUM_INPUTS), lane-dense padded output -----
    out = jnp.dot(h.astype(jnp.bfloat16), wo_ref[...],
                  preferred_element_type=jnp.float32) + bo_ref[...]
    o_ref[...] = out.astype(o_ref.dtype)


def init_params(key):
    """PyTorch-convention parameters (Linear: W [out, in], b [out])."""
    params = {}
    ks = jax.random.split(key, NUM_LAYERS + 1)
    for nl in range(NUM_LAYERS):
        nin = D_IN if nl == 0 else HIDDEN
        kw, kb = jax.random.split(ks[nl])
        bound = 1.0 / (nin ** 0.5)
        params[f"fc_{nl}"] = (
            jax.random.uniform(kw, (HIDDEN, nin), jnp.float32, -bound, bound),
            jax.random.uniform(kb, (HIDDEN,), jnp.float32, -bound, bound),
        )
        params[f"prelu_{nl}"] = jnp.full((HIDDEN,), 0.25, jnp.float32)   # PReLU default
        params[f"bn_{nl}"] = (jnp.ones((HIDDEN,), jnp.float32),          # gamma
                              jnp.zeros((HIDDEN,), jnp.float32))         # beta
    kw, kb = jax.random.split(ks[-1])
    bound = 1.0 / (HIDDEN ** 0.5)
    params["out_fc"] = (
        jax.random.uniform(kw, (NUM_INPUTS, HIDDEN), jnp.float32, -bound, bound),
        jax.random.uniform(kb, (NUM_INPUTS,), jnp.float32, -bound, bound),
    )
    return params


def pack_params(params):
    """Kernel layout: transposed, lane-padded, weights cast to bf16 (f32 accumulate)."""
    def pad2(a, rows, cols):
        return jnp.pad(a, ((0, rows - a.shape[0]), (0, cols - a.shape[1])))

    def pad1(a, n):
        return jnp.pad(a, (0, n - a.shape[0]))

    w0 = pad2(params["fc_0"][0].T, D_IN_PAD, H_PAD).astype(jnp.bfloat16)
    wh = jnp.stack([pad2(params[f"fc_{nl}"][0].T, H_PAD, H_PAD)
                    for nl in range(1, NUM_LAYERS)]).astype(jnp.bfloat16)
    b = jnp.stack([pad1(params[f"fc_{nl}"][1], H_PAD) for nl in range(NUM_LAYERS)])
    alpha = jnp.stack([pad1(params[f"prelu_{nl}"], H_PAD) for nl in range(NUM_LAYERS)])
    gamma = jnp.stack([pad1(params[f"bn_{nl}"][0], H_PAD) for nl in range(NUM_LAYERS)])
    beta = jnp.stack([pad1(params[f"bn_{nl}"][1], H_PAD) for nl in range(NUM_LAYERS)])
    wo = pad2(params["out_fc"][0].T, H_PAD, D_OUT_PAD).astype(jnp.bfloat16)
    bo = pad1(params["out_fc"][1], D_OUT_PAD).reshape(1, D_OUT_PAD)
    return (w0, wh, b, alpha, gamma, beta, wo, bo)


def dnn_reference(x, params):
    """Pure-JAX f32 reference with PyTorch training-mode BatchNorm semantics."""
    h = x
    for nl in range(NUM_LAYERS):
        W, bb = params[f"fc_{nl}"]
        h = h @ W.T + bb
        a = params[f"prelu_{nl}"]
        h = jnp.maximum(h, 0.0) + a * jnp.minimum(h, 0.0)
        g, be = params[f"bn_{nl}"]
        mean = jnp.mean(h, axis=0)
        var = jnp.mean((h - mean) ** 2, axis=0)
        h = (h - mean) * jax.lax.rsqrt(var + BN_EPS) * g + be
    W, bb = params["out_fc"]
    return h @ W.T + bb


@jax.jit
def dnn_forward(x, packed_params):
    (w0, wh, b, alpha, gamma, beta, wo, bo) = packed_params
    B, d_in = x.shape

    # Batch tiling: one grid step per `tb` rows; weights/params stay resident in
    # VMEM across iterations (constant index_maps, single-buffered). If B > tb
    # the BatchNorm statistics become per-tile (see kernel docstring).
    tb = min(MAX_TILE_B, _round_up(B, 8))
    b_pad = _round_up(B, tb)
    needs_mask = (B % tb) != 0
    # Pad + cast x to bf16: halves the streaming HBM->VMEM DMA; layer-0 matmul
    # consumes it directly (no in-kernel f32 round-trip).
    x_p = jnp.pad(x, ((0, b_pad - B), (0, D_IN_PAD - d_in))).astype(jnp.bfloat16)

    kernel = functools.partial(dnn_kernel, tb=tb, b_total=B, needs_mask=needs_mask)
    res2 = lambda i: (0, 0)       # resident (re-used, not re-DMA'd) across grid steps
    res3 = lambda i: (0, 0, 0)
    single = pl.Buffered(1)       # constant-index inputs: no double-buffering needed

    out = pl.pallas_call(
        kernel,
        out_shape=jax.ShapeDtypeStruct((b_pad, D_OUT_PAD), jnp.float32),
        grid=(b_pad // tb,),
        in_specs=[
            pl.BlockSpec((tb, D_IN_PAD), lambda i: (i, 0)),   # x: blocked over batch
            pl.BlockSpec(w0.shape, res2, pipeline_mode=single),
            pl.BlockSpec(wh.shape, res3, pipeline_mode=single),
            pl.BlockSpec(b.shape, res2, pipeline_mode=single),
            pl.BlockSpec(alpha.shape, res2, pipeline_mode=single),
            pl.BlockSpec(gamma.shape, res2, pipeline_mode=single),
            pl.BlockSpec(beta.shape, res2, pipeline_mode=single),
            pl.BlockSpec(wo.shape, res2, pipeline_mode=single),
            pl.BlockSpec(bo.shape, res2, pipeline_mode=single),
        ],
        out_specs=pl.BlockSpec((tb, D_OUT_PAD), lambda i: (i, 0)),
        compiler_params=pltpu.CompilerParams(
            # Megacore: independent batch tiles may split over TCs (only kicks in
            # when B > tb; with a single tile, one TC handles everything).
            dimension_semantics=("parallel",),
            # No vmem_limit override: scoped defaults (16/32 MiB) comfortably
            # cover <1 MiB of buffers here and leave headroom on v7x.
        ),
    )(x_p, w0, wh, b, alpha, gamma, beta, wo, bo)

    return out[:B, :NUM_INPUTS]


if __name__ == "__main__":
    key = jax.random.PRNGKey(0)
    k_x, k_p = jax.random.split(key)
    # Batch of LPS frames: [B, num_inputs * in_frames]
    x = jax.random.normal(k_x, (BATCH, NUM_INPUTS * IN_FRAMES), jnp.float32)
    params = init_params(k_p)
    packed = pack_params(params)

    y = dnn_forward(x, packed)
    jax.block_until_ready(y)
    assert y.shape == (BATCH, NUM_INPUTS), y.shape

    # Correctness vs pure-JAX f32 reference (bf16 matmul / bf16-input tolerance).
    y_ref = dnn_reference(x, params)
    assert bool(jnp.isfinite(y).all()), "non-finite output"
    err = float(jnp.max(jnp.abs(y - y_ref)))
    assert err < 0.15, f"kernel vs reference max abs err {err}"
    print("KERNEL_OK")
</pallas_src>

<mosaic_0001>
module attributes {stable_mosaic.version = 11 : i64} {
  func.func @dnn_kernel(%arg0: i32, %arg1: memref<8x128xbf16, #tpu.memory_space<vmem>>, %arg2: memref<128x128xbf16, #tpu.memory_space<vmem>>, %arg3: memref<3x128x128xbf16, #tpu.memory_space<vmem>>, %arg4: memref<4x128xf32, #tpu.memory_space<vmem>>, %arg5: memref<4x128xf32, #tpu.memory_space<vmem>>, %arg6: memref<4x128xf32, #tpu.memory_space<vmem>>, %arg7: memref<4x128xf32, #tpu.memory_space<vmem>>, %arg8: memref<128x128xbf16, #tpu.memory_space<vmem>>, %arg9: memref<1x128xf32, #tpu.memory_space<vmem>>, %arg10: memref<8x128xf32, #tpu.memory_space<vmem>>) attributes {dimension_semantics = [#tpu.dimension_semantics<parallel>], iteration_bounds = array<i64: 1>, scalar_prefetch = 0 : i64, scratch_operands = 0 : i64, tpu.core_type = #tpu.core_type<tc>, window_params = [{transform_indices = @transform_0, window_bounds = array<i64: 8, 128>}, {pipeline_mode = #tpu.pipeline_mode<synchronous>, transform_indices = @transform_1, window_bounds = array<i64: 128, 128>}, {pipeline_mode = #tpu.pipeline_mode<synchronous>, transform_indices = @transform_2, window_bounds = array<i64: 3, 128, 128>}, {pipeline_mode = #tpu.pipeline_mode<synchronous>, transform_indices = @transform_3, window_bounds = array<i64: 4, 128>}, {pipeline_mode = #tpu.pipeline_mode<synchronous>, transform_indices = @transform_4, window_bounds = array<i64: 4, 128>}, {pipeline_mode = #tpu.pipeline_mode<synchronous>, transform_indices = @transform_5, window_bounds = array<i64: 4, 128>}, {pipeline_mode = #tpu.pipeline_mode<synchronous>, transform_indices = @transform_6, window_bounds = array<i64: 4, 128>}, {pipeline_mode = #tpu.pipeline_mode<synchronous>, transform_indices = @transform_7, window_bounds = array<i64: 128, 128>}, {pipeline_mode = #tpu.pipeline_mode<synchronous>, transform_indices = @transform_8, window_bounds = array<i64: 1, 128>}, {transform_indices = @transform_9, window_bounds = array<i64: 8, 128>}]} {
    %c0 = arith.constant 0 : index
    %c0_0 = arith.constant 0 : index
    %0 = vector.load %arg4[%c0, %c0_0] : memref<4x128xf32, #tpu.memory_space<vmem>>, vector<4x128xf32>
    %c0_1 = arith.constant 0 : index
    %c0_2 = arith.constant 0 : index
    %1 = vector.load %arg5[%c0_1, %c0_2] : memref<4x128xf32, #tpu.memory_space<vmem>>, vector<4x128xf32>
    %c0_3 = arith.constant 0 : index
    %c0_4 = arith.constant 0 : index
    %2 = vector.load %arg6[%c0_3, %c0_4] : memref<4x128xf32, #tpu.memory_space<vmem>>, vector<4x128xf32>
    %c0_5 = arith.constant 0 : index
    %c0_6 = arith.constant 0 : index
    %3 = vector.load %arg7[%c0_5, %c0_6] : memref<4x128xf32, #tpu.memory_space<vmem>>, vector<4x128xf32>
    %c0_7 = arith.constant 0 : index
    %c0_8 = arith.constant 0 : index
    %4 = vector.load %arg1[%c0_7, %c0_8] : memref<8x128xbf16, #tpu.memory_space<vmem>>, vector<8x128xbf16>
    %c0_9 = arith.constant 0 : index
    %c0_10 = arith.constant 0 : index
    %5 = vector.load %arg2[%c0_9, %c0_10] : memref<128x128xbf16, #tpu.memory_space<vmem>>, vector<128x128xbf16>
    %6 = vector.extract_strided_slice %0 {offsets = [0, 0], sizes = [1, 128], strides = [1, 1]} : vector<4x128xf32> to vector<1x128xf32>
    %7 = vector.extract_strided_slice %1 {offsets = [0, 0], sizes = [1, 128], strides = [1, 1]} : vector<4x128xf32> to vector<1x128xf32>
    %8 = vector.extract_strided_slice %2 {offsets = [0, 0], sizes = [1, 128], strides = [1, 1]} : vector<4x128xf32> to vector<1x128xf32>
    %9 = vector.extract_strided_slice %3 {offsets = [0, 0], sizes = [1, 128], strides = [1, 1]} : vector<4x128xf32> to vector<1x128xf32>
    %cst = arith.constant dense<0.000000e+00> : vector<8x128xf32>
    %10 = tpu.matmul %4, %5, %cst {dimension_numbers = #tpu.dot_dimension_numbers<[1], [0], [0], [1], [0, 0, 1, 1], [], []>} : vector<8x128xbf16>, vector<128x128xbf16>, vector<8x128xf32> -> vector<8x128xf32>
    %11 = vector.broadcast %6 : vector<1x128xf32> to vector<8x128xf32>
    %12 = arith.addf %10, %11 : vector<8x128xf32>
    %cst_11 = arith.constant 0.000000e+00 : f32
    %13 = vector.broadcast %cst_11 : f32 to vector<8x128xf32>
    %14 = arith.maximumf %12, %13 : vector<8x128xf32>
    %cst_12 = arith.constant 0.000000e+00 : f32
    %15 = vector.broadcast %cst_12 : f32 to vector<8x128xf32>
    %16 = arith.minimumf %12, %15 : vector<8x128xf32>
    %17 = vector.broadcast %7 : vector<1x128xf32> to vector<8x128xf32>
    %18 = arith.mulf %17, %16 : vector<8x128xf32>
    %19 = arith.addf %14, %18 : vector<8x128xf32>
    %cst_13 = arith.constant dense<0.000000e+00> : vector<128xf32>
    %20 = vector.multi_reduction <add>, %19, %cst_13 [0] : vector<8x128xf32> to vector<128xf32>
    %21 = vector.shape_cast %20 : vector<128xf32> to vector<1x128xf32>
    %22 = arith.mulf %19, %19 : vector<8x128xf32>
    %cst_14 = arith.constant dense<0.000000e+00> : vector<128xf32>
    %23 = vector.multi_reduction <add>, %22, %cst_14 [0] : vector<8x128xf32> to vector<128xf32>
    %24 = vector.shape_cast %23 : vector<128xf32> to vector<1x128xf32>
    %cst_15 = arith.constant 1.250000e-01 : f32
    %25 = vector.broadcast %cst_15 : f32 to vector<1x128xf32>
    %26 = arith.mulf %21, %25 : vector<1x128xf32>
    %cst_16 = arith.constant 1.250000e-01 : f32
    %27 = vector.broadcast %cst_16 : f32 to vector<1x128xf32>
    %28 = arith.mulf %24, %27 : vector<1x128xf32>
    %29 = arith.mulf %26, %26 : vector<1x128xf32>
    %30 = arith.subf %28, %29 : vector<1x128xf32>
    %cst_17 = arith.constant 0.000000e+00 : f32
    %31 = vector.broadcast %cst_17 : f32 to vector<1x128xf32>
    %32 = arith.maximumf %30, %31 : vector<1x128xf32>
    %cst_18 = arith.constant 9.99999974E-6 : f32
    %33 = vector.broadcast %cst_18 : f32 to vector<1x128xf32>
    %34 = arith.addf %32, %33 : vector<1x128xf32>
    %35 = math.rsqrt %34 : vector<1x128xf32>
    %36 = arith.mulf %8, %35 : vector<1x128xf32>
    %37 = arith.mulf %26, %36 : vector<1x128xf32>
    %38 = arith.subf %9, %37 : vector<1x128xf32>
    %39 = vector.broadcast %36 : vector<1x128xf32> to vector<8x128xf32>
    %40 = arith.mulf %19, %39 : vector<8x128xf32>
    %41 = vector.broadcast %38 : vector<1x128xf32> to vector<8x128xf32>
    %42 = arith.addf %40, %41 : vector<8x128xf32>
    %c0_19 = arith.constant 0 : index
    %c0_20 = arith.constant 0 : index
    %c0_21 = arith.constant 0 : index
    %43 = vector.load %arg3[%c0_19, %c0_20, %c0_21] : memref<3x128x128xbf16, #tpu.memory_space<vmem>>, vector<1x128x128xbf16>
    %44 = vector.shape_cast %43 : vector<1x128x128xbf16> to vector<128x128xbf16>
    %45 = vector.extract_strided_slice %0 {offsets = [1, 0], sizes = [1, 128], strides = [1, 1]} : vector<4x128xf32> to vector<1x128xf32>
    %46 = vector.extract_strided_slice %1 {offsets = [1, 0], sizes = [1, 128], strides = [1, 1]} : vector<4x128xf32> to vector<1x128xf32>
    %47 = vector.extract_strided_slice %2 {offsets = [1, 0], sizes = [1, 128], strides = [1, 1]} : vector<4x128xf32> to vector<1x128xf32>
    %48 = vector.extract_strided_slice %3 {offsets = [1, 0], sizes = [1, 128], strides = [1, 1]} : vector<4x128xf32> to vector<1x128xf32>
    %49 = arith.truncf %42 : vector<8x128xf32> to vector<8x128xbf16>
    %cst_22 = arith.constant dense<0.000000e+00> : vector<8x128xf32>
    %50 = tpu.matmul %49, %44, %cst_22 {dimension_numbers = #tpu.dot_dimension_numbers<[1], [0], [0], [1], [0, 0, 1, 1], [], []>} : vector<8x128xbf16>, vector<128x128xbf16>, vector<8x128xf32> -> vector<8x128xf32>
    %51 = vector.broadcast %45 : vector<1x128xf32> to vector<8x128xf32>
    %52 = arith.addf %50, %51 : vector<8x128xf32>
    %cst_23 = arith.constant 0.000000e+00 : f32
    %53 = vector.broadcast %cst_23 : f32 to vector<8x128xf32>
    %54 = arith.maximumf %52, %53 : vector<8x128xf32>
    %cst_24 = arith.constant 0.000000e+00 : f32
    %55 = vector.broadcast %cst_24 : f32 to vector<8x128xf32>
    %56 = arith.minimumf %52, %55 : vector<8x128xf32>
    %57 = vector.broadcast %46 : vector<1x128xf32> to vector<8x128xf32>
    %58 = arith.mulf %57, %56 : vector<8x128xf32>
    %59 = arith.addf %54, %58 : vector<8x128xf32>
    %cst_25 = arith.constant dense<0.000000e+00> : vector<128xf32>
    %60 = vector.multi_reduction <add>, %59, %cst_25 [0] : vector<8x128xf32> to vector<128xf32>
    %61 = vector.shape_cast %60 : vector<128xf32> to vector<1x128xf32>
    %62 = arith.mulf %59, %59 : vector<8x128xf32>
    %cst_26 = arith.constant dense<0.000000e+00> : vector<128xf32>
    %63 = vector.multi_reduction <add>, %62, %cst_26 [0] : vector<8x128xf32> to vector<128xf32>
    %64 = vector.shape_cast %63 : vector<128xf32> to vector<1x128xf32>
    %cst_27 = arith.constant 1.250000e-01 : f32
    %65 = vector.broadcast %cst_27 : f32 to vector<1x128xf32>
    %66 = arith.mulf %61, %65 : vector<1x128xf32>
    %cst_28 = arith.constant 1.250000e-01 : f32
    %67 = vector.broadcast %cst_28 : f32 to vector<1x128xf32>
    %68 = arith.mulf %64, %67 : vector<1x128xf32>
    %69 = arith.mulf %66, %66 : vector<1x128xf32>
    %70 = arith.subf %68, %69 : vector<1x128xf32>
    %cst_29 = arith.constant 0.000000e+00 : f32
    %71 = vector.broadcast %cst_29 : f32 to vector<1x128xf32>
    %72 = arith.maximumf %70, %71 : vector<1x128xf32>
    %cst_30 = arith.constant 9.99999974E-6 : f32
    %73 = vector.broadcast %cst_30 : f32 to vector<1x128xf32>
    %74 = arith.addf %72, %73 : vector<1x128xf32>
    %75 = math.rsqrt %74 : vector<1x128xf32>
    %76 = arith.mulf %47, %75 : vector<1x128xf32>
    %77 = arith.mulf %66, %76 : vector<1x128xf32>
    %78 = arith.subf %48, %77 : vector<1x128xf32>
    %79 = vector.broadcast %76 : vector<1x128xf32> to vector<8x128xf32>
    %80 = arith.mulf %59, %79 : vector<8x128xf32>
    %81 = vector.broadcast %78 : vector<1x128xf32> to vector<8x128xf32>
    %82 = arith.addf %80, %81 : vector<8x128xf32>
    %c1 = arith.constant 1 : index
    %c0_31 = arith.constant 0 : index
    %c0_32 = arith.constant 0 : index
    %83 = vector.load %arg3[%c1, %c0_31, %c0_32] : memref<3x128x128xbf16, #tpu.memory_space<vmem>>, vector<1x128x128xbf16>
    %84 = vector.shape_cast %83 : vector<1x128x128xbf16> to vector<128x128xbf16>
    %85 = vector.extract_strided_slice %0 {offsets = [2, 0], sizes = [1, 128], strides = [1, 1]} : vector<4x128xf32> to vector<1x128xf32>
    %86 = vector.extract_strided_slice %1 {offsets = [2, 0], sizes = [1, 128], strides = [1, 1]} : vector<4x128xf32> to vector<1x128xf32>
    %87 = vector.extract_strided_slice %2 {offsets = [2, 0], sizes = [1, 128], strides = [1, 1]} : vector<4x128xf32> to vector<1x128xf32>
    %88 = vector.extract_strided_slice %3 {offsets = [2, 0], sizes = [1, 128], strides = [1, 1]} : vector<4x128xf32> to vector<1x128xf32>
    %89 = arith.truncf %82 : vector<8x128xf32> to vector<8x128xbf16>
    %cst_33 = arith.constant dense<0.000000e+00> : vector<8x128xf32>
    %90 = tpu.matmul %89, %84, %cst_33 {dimension_numbers = #tpu.dot_dimension_numbers<[1], [0], [0], [1], [0, 0, 1, 1], [], []>} : vector<8x128xbf16>, vector<128x128xbf16>, vector<8x128xf32> -> vector<8x128xf32>
    %91 = vector.broadcast %85 : vector<1x128xf32> to vector<8x128xf32>
    %92 = arith.addf %90, %91 : vector<8x128xf32>
    %cst_34 = arith.constant 0.000000e+00 : f32
    %93 = vector.broadcast %cst_34 : f32 to vector<8x128xf32>
    %94 = arith.maximumf %92, %93 : vector<8x128xf32>
    %cst_35 = arith.constant 0.000000e+00 : f32
    %95 = vector.broadcast %cst_35 : f32 to vector<8x128xf32>
    %96 = arith.minimumf %92, %95 : vector<8x128xf32>
    %97 = vector.broadcast %86 : vector<1x128xf32> to vector<8x128xf32>
    %98 = arith.mulf %97, %96 : vector<8x128xf32>
    %99 = arith.addf %94, %98 : vector<8x128xf32>
    %cst_36 = arith.constant dense<0.000000e+00> : vector<128xf32>
    %100 = vector.multi_reduction <add>, %99, %cst_36 [0] : vector<8x128xf32> to vector<128xf32>
    %101 = vector.shape_cast %100 : vector<128xf32> to vector<1x128xf32>
    %102 = arith.mulf %99, %99 : vector<8x128xf32>
    %cst_37 = arith.constant dense<0.000000e+00> : vector<128xf32>
    %103 = vector.multi_reduction <add>, %102, %cst_37 [0] : vector<8x128xf32> to vector<128xf32>
    %104 = vector.shape_cast %103 : vector<128xf32> to vector<1x128xf32>
    %cst_38 = arith.constant 1.250000e-01 : f32
    %105 = vector.broadcast %cst_38 : f32 to vector<1x128xf32>
    %106 = arith.mulf %101, %105 : vector<1x128xf32>
    %cst_39 = arith.constant 1.250000e-01 : f32
    %107 = vector.broadcast %cst_39 : f32 to vector<1x128xf32>
    %108 = arith.mulf %104, %107 : vector<1x128xf32>
    %109 = arith.mulf %106, %106 : vector<1x128xf32>
    %110 = arith.subf %108, %109 : vector<1x128xf32>
    %cst_40 = arith.constant 0.000000e+00 : f32
    %111 = vector.broadcast %cst_40 : f32 to vector<1x128xf32>
    %112 = arith.maximumf %110, %111 : vector<1x128xf32>
    %cst_41 = arith.constant 9.99999974E-6 : f32
    %113 = vector.broadcast %cst_41 : f32 to vector<1x128xf32>
    %114 = arith.addf %112, %113 : vector<1x128xf32>
    %115 = math.rsqrt %114 : vector<1x128xf32>
    %116 = arith.mulf %87, %115 : vector<1x128xf32>
    %117 = arith.mulf %106, %116 : vector<1x128xf32>
    %118 = arith.subf %88, %117 : vector<1x128xf32>
    %119 = vector.broadcast %116 : vector<1x128xf32> to vector<8x128xf32>
    %120 = arith.mulf %99, %119 : vector<8x128xf32>
    %121 = vector.broadcast %118 : vector<1x128xf32> to vector<8x128xf32>
    %122 = arith.addf %120, %121 : vector<8x128xf32>
    %c2 = arith.constant 2 : index
    %c0_42 = arith.constant 0 : index
    %c0_43 = arith.constant 0 : index
    %123 = vector.load %arg3[%c2, %c0_42, %c0_43] : memref<3x128x128xbf16, #tpu.memory_space<vmem>>, vector<1x128x128xbf16>
    %124 = vector.shape_cast %123 : vector<1x128x128xbf16> to vector<128x128xbf16>
    %125 = vector.extract_strided_slice %0 {offsets = [3, 0], sizes = [1, 128], strides = [1, 1]} : vector<4x128xf32> to vector<1x128xf32>
    %126 = vector.extract_strided_slice %1 {offsets = [3, 0], sizes = [1, 128], strides = [1, 1]} : vector<4x128xf32> to vector<1x128xf32>
    %127 = vector.extract_strided_slice %2 {offsets = [3, 0], sizes = [1, 128], strides = [1, 1]} : vector<4x128xf32> to vector<1x128xf32>
    %128 = vector.extract_strided_slice %3 {offsets = [3, 0], sizes = [1, 128], strides = [1, 1]} : vector<4x128xf32> to vector<1x128xf32>
    %129 = arith.truncf %122 : vector<8x128xf32> to vector<8x128xbf16>
    %cst_44 = arith.constant dense<0.000000e+00> : vector<8x128xf32>
    %130 = tpu.matmul %129, %124, %cst_44 {dimension_numbers = #tpu.dot_dimension_numbers<[1], [0], [0], [1], [0, 0, 1, 1], [], []>} : vector<8x128xbf16>, vector<128x128xbf16>, vector<8x128xf32> -> vector<8x128xf32>
    %131 = vector.broadcast %125 : vector<1x128xf32> to vector<8x128xf32>
    %132 = arith.addf %130, %131 : vector<8x128xf32>
    %cst_45 = arith.constant 0.000000e+00 : f32
    %133 = vector.broadcast %cst_45 : f32 to vector<8x128xf32>
    %134 = arith.maximumf %132, %133 : vector<8x128xf32>
    %cst_46 = arith.constant 0.000000e+00 : f32
    %135 = vector.broadcast %cst_46 : f32 to vector<8x128xf32>
    %136 = arith.minimumf %132, %135 : vector<8x128xf32>
    %137 = vector.broadcast %126 : vector<1x128xf32> to vector<8x128xf32>
    %138 = arith.mulf %137, %136 : vector<8x128xf32>
    %139 = arith.addf %134, %138 : vector<8x128xf32>
    %cst_47 = arith.constant dense<0.000000e+00> : vector<128xf32>
    %140 = vector.multi_reduction <add>, %139, %cst_47 [0] : vector<8x128xf32> to vector<128xf32>
    %141 = vector.shape_cast %140 : vector<128xf32> to vector<1x128xf32>
    %142 = arith.mulf %139, %139 : vector<8x128xf32>
    %cst_48 = arith.constant dense<0.000000e+00> : vector<128xf32>
    %143 = vector.multi_reduction <add>, %142, %cst_48 [0] : vector<8x128xf32> to vector<128xf32>
    %144 = vector.shape_cast %143 : vector<128xf32> to vector<1x128xf32>
    %cst_49 = arith.constant 1.250000e-01 : f32
    %145 = vector.broadcast %cst_49 : f32 to vector<1x128xf32>
    %146 = arith.mulf %141, %145 : vector<1x128xf32>
    %cst_50 = arith.constant 1.250000e-01 : f32
    %147 = vector.broadcast %cst_50 : f32 to vector<1x128xf32>
    %148 = arith.mulf %144, %147 : vector<1x128xf32>
    %149 = arith.mulf %146, %146 : vector<1x128xf32>
    %150 = arith.subf %148, %149 : vector<1x128xf32>
    %cst_51 = arith.constant 0.000000e+00 : f32
    %151 = vector.broadcast %cst_51 : f32 to vector<1x128xf32>
    %152 = arith.maximumf %150, %151 : vector<1x128xf32>
    %cst_52 = arith.constant 9.99999974E-6 : f32
    %153 = vector.broadcast %cst_52 : f32 to vector<1x128xf32>
    %154 = arith.addf %152, %153 : vector<1x128xf32>
    %155 = math.rsqrt %154 : vector<1x128xf32>
    %156 = arith.mulf %127, %155 : vector<1x128xf32>
    %157 = arith.mulf %146, %156 : vector<1x128xf32>
    %158 = arith.subf %128, %157 : vector<1x128xf32>
    %159 = vector.broadcast %156 : vector<1x128xf32> to vector<8x128xf32>
    %160 = arith.mulf %139, %159 : vector<8x128xf32>
    %161 = vector.broadcast %158 : vector<1x128xf32> to vector<8x128xf32>
    %162 = arith.addf %160, %161 : vector<8x128xf32>
    %163 = arith.truncf %162 : vector<8x128xf32> to vector<8x128xbf16>
    %c0_53 = arith.constant 0 : index
    %c0_54 = arith.constant 0 : index
    %164 = vector.load %arg8[%c0_53, %c0_54] : memref<128x128xbf16, #tpu.memory_space<vmem>>, vector<128x128xbf16>
    %cst_55 = arith.constant dense<0.000000e+00> : vector<8x128xf32>
    %165 = tpu.matmul %163, %164, %cst_55 {dimension_numbers = #tpu.dot_dimension_numbers<[1], [0], [0], [1], [0, 0, 1, 1], [], []>} : vector<8x128xbf16>, vector<128x128xbf16>, vector<8x128xf32> -> vector<8x128xf32>
    %c0_56 = arith.constant 0 : index
    %c0_57 = arith.constant 0 : index
    %166 = vector.load %arg9[%c0_56, %c0_57] : memref<1x128xf32, #tpu.memory_space<vmem>>, vector<1x128xf32>
    %167 = vector.broadcast %166 : vector<1x128xf32> to vector<8x128xf32>
    %168 = arith.addf %165, %167 : vector<8x128xf32>
    %c0_58 = arith.constant 0 : index
    %c0_59 = arith.constant 0 : index
    %169 = vector.load %arg10[%c0_58, %c0_59] : memref<8x128xf32, #tpu.memory_space<vmem>>, vector<8x128xf32>
    tpu.vector_store %arg10[%c0_58, %c0_59], %168 {strides = array<i32>} : memref<8x128xf32, #tpu.memory_space<vmem>>, vector<8x128xf32>,
    return
  }
  func.func @transform_0(%arg0: i32) -> (i32, i32) {
    %c0_i32 = arith.constant 0 : i32
    %c0_i32_0 = arith.constant 0 : i32
    return %arg0, %c0_i32 : i32, i32
  }
  func.func @transform_1(%arg0: i32) -> (i32, i32) {
    %c0_i32 = arith.constant 0 : i32
    %c0_i32_0 = arith.constant 0 : i32
    %c0_i32_1 = arith.constant 0 : i32
    return %c0_i32, %c0_i32_0 : i32, i32
  }
  func.func @transform_2(%arg0: i32) -> (i32, i32, i32) {
    %c0_i32 = arith.constant 0 : i32
    %c0_i32_0 = arith.constant 0 : i32
    %c0_i32_1 = arith.constant 0 : i32
    %c0_i32_2 = arith.constant 0 : i32
    return %c0_i32, %c0_i32_0, %c0_i32_1 : i32, i32, i32
  }
  func.func @transform_3(%arg0: i32) -> (i32, i32) {
    %c0_i32 = arith.constant 0 : i32
    %c0_i32_0 = arith.constant 0 : i32
    %c0_i32_1 = arith.constant 0 : i32
    return %c0_i32, %c0_i32_0 : i32, i32
  }
  func.func @transform_4(%arg0: i32) -> (i32, i32) {
    %c0_i32 = arith.constant 0 : i32
    %c0_i32_0 = arith.constant 0 : i32
    %c0_i32_1 = arith.constant 0 : i32
    return %c0_i32, %c0_i32_0 : i32, i32
  }
  func.func @transform_5(%arg0: i32) -> (i32, i32) {
    %c0_i32 = arith.constant 0 : i32
    %c0_i32_0 = arith.constant 0 : i32
    %c0_i32_1 = arith.constant 0 : i32
    return %c0_i32, %c0_i32_0 : i32, i32
  }
  func.func @transform_6(%arg0: i32) -> (i32, i32) {
    %c0_i32 = arith.constant 0 : i32
    %c0_i32_0 = arith.constant 0 : i32
    %c0_i32_1 = arith.constant 0 : i32
    return %c0_i32, %c0_i32_0 : i32, i32
  }
  func.func @transform_7(%arg0: i32) -> (i32, i32) {
    %c0_i32 = arith.constant 0 : i32
    %c0_i32_0 = arith.constant 0 : i32
    %c0_i32_1 = arith.constant 0 : i32
    return %c0_i32, %c0_i32_0 : i32, i32
  }
  func.func @transform_8(%arg0: i32) -> (i32, i32) {
    %c0_i32 = arith.constant 0 : i32
    %c0_i32_0 = arith.constant 0 : i32
    %c0_i32_1 = arith.constant 0 : i32
    return %c0_i32, %c0_i32_0 : i32, i32
  }
  func.func @transform_9(%arg0: i32) -> (i32, i32) {
    %c0_i32 = arith.constant 0 : i32
    %c0_i32_0 = arith.constant 0 : i32
    return %arg0, %c0_i32 : i32, i32
  }
}

</mosaic_0001>

<bundles_post_ra>
// kernel: dnn_forward.1
= control target key start
LH: loop header
LB: loop body
LE: loop exit
PB: predicated region body
PF: predicated region fallthrough
CT: control target
= control target key end

     0   :  { %14 = vsyncpa [#allocation3], 0  ;;  %s1306_s0 = inlined_call_operand.vmem [shape: bf16[8,128], index: 0, kind: input, shape index: {}]   ;;  %s1307_s1 = inlined_call_operand.hbm [shape: bf16[128,128], index: 1, kind: input, shape index: {}]   ;;  %s1308_s2 = inlined_call_operand.hbm [shape: bf16[3,128,128], index: 2, kind: input, shape index: {}]   ;;  %s1309_s3 = inlined_call_operand.vmem [shape: f32[4,128], index: 3, kind: input, shape index: {}]   ;;  %s1310_s4 = inlined_call_operand.vmem [shape: f32[4,128], index: 4, kind: input, shape index: {}]   ;;  %s1311_s5 = inlined_call_operand.vmem [shape: f32[4,128], index: 5, kind: input, shape index: {}]   ;;  %s1312_s6 = inlined_call_operand.vmem [shape: f32[4,128], index: 6, kind: input, shape index: {}]   ;;  %s1313_s7 = inlined_call_operand.hbm [shape: bf16[128,128], index: 7, kind: input, shape index: {}]   ;;  %s1314_s8 = inlined_call_operand.vmem [shape: f32[1,128], index: 8, kind: input, shape index: {}]   ;;  %s1315_s9 = inlined_call_operand.hbm [shape: f32[8,128], index: 9, kind: output, shape index: {}]  }
   0x1   :  { %15 = vsyncpa [#allocation6], 0 }
   0x2   :  { %16 = vsyncpa [#allocation4], 0  ;;  %s1138_s30 = smov [#allocation5]   ;;  %s1139_s11 = smov [#allocation2]  }
   0x3   :  { %s36_s10 = sshll.u32 %s1138_s30, 4  ;;  %s24_s12 = sshll.u32 %s1139_s11, 4  ;;  %s37_s10 = int_to_ptr.vmem [resolvable:$true] %s36_s10  ;;  %s25_s12 = int_to_ptr.vmem [resolvable:$true] %s24_s12 }
   0x4   :  { %s1060_s13 = scalar_lea.vmem %s37_s10, 3072  ;;  %p1065_p1 = scmp.lt.s32.totalorder %s37_s10, %s37_s10 }
   0x5   :  { %p1061_p0 = scmp.ne.s32.totalorder %s37_s10, %s1060_s13  ;;  %p1066_p2 = scmp.lt.s32.totalorder %s1060_s13, %s1060_s13 }
   0x7   :  { %p1067_p3 = por %p1066_p2, %p1065_p1 }
   0x9   :  { %p1068_p4 = pnand %p1067_p3, %p1061_p0 }
   0xb   :  { %1071 = shalt.err (!%p1068_p4)
}
   0xc   :  { %s1140_s14 = smov 64   ;;  %s1141_s15 = smov 4  }
   0xd   :  { %42 = dma.hbm_to_vmem [thread:$0]  %s1308_s2, 3072, %s37_s10, [#allocation6], %s1140_s14, %s1140_s14, %s1141_s15  }
   0xe   :  { %s1080_s18 = scalar_lea.vmem %s25_s12, 1024  ;;  %p1085_p6 = scmp.lt.s32.totalorder %s25_s12, %s25_s12 }
   0xf   :  { %p1081_p5 = scmp.ne.s32.totalorder %s25_s12, %s1080_s18  ;;  %p1086_p7 = scmp.lt.s32.totalorder %s1080_s18, %s1080_s18 }
  0x11   :  { %p1087_p8 = por %p1086_p7, %p1085_p6 }
  0x13   :  { %p1088_p9 = pnand %p1087_p8, %p1081_p5 }
  0x15   :  { %1091 = shalt.err (!%p1088_p9)
}
  0x16   :  { %30 = dma.hbm_to_vmem [thread:$0]  %s1307_s1, 1024, %s25_s12, [#allocation3], %s1140_s14, %s1140_s14, %s1141_s15  }
  0x17   :  { %s1142_s21 = smov [#allocation7]  }
  0x18   :  { %s56_s22 = sshll.u32 %s1142_s21, 4  ;;  %s57_s22 = int_to_ptr.vmem [resolvable:$true] %s56_s22 }
  0x19   :  { %s1100_s23 = scalar_lea.vmem %s57_s22, 1024  ;;  %p1105_p11 = scmp.lt.s32.totalorder %s57_s22, %s57_s22 }
  0x1a   :  { %p1101_p10 = scmp.ne.s32.totalorder %s57_s22, %s1100_s23  ;;  %p1106_p12 = scmp.lt.s32.totalorder %s1100_s23, %s1100_s23 }
  0x1c   :  { %p1107_p13 = por %p1106_p12, %p1105_p11 }
  0x1e   :  { %p1108_p0 = pnand %p1107_p13, %p1101_p10 }
  0x20   :  { %1111 = shalt.err (!%p1108_p0)
}
  0x21   :  { %62 = dma.hbm_to_vmem [thread:$0]  %s1313_s7, 1024, %s57_s22, [#allocation6], %s1140_s14, %s1140_s14, %s1141_s15  }
  0x22   :  { %1132 = dma.done.wait [#allocation3], 1024  }
  0x23   :  { %1133 = vsyncadd [#allocation3], 4294966272 }
  0x24   :  { %1134 = dma.done.wait [#allocation6], 4096  }
  0x25   :  { %1135 = vsyncadd [#allocation6], 4294963200  ;;  %v1143_v0 = vmov 0.0   ;;  %vm1144_vm0 = vmmov 0   ;;  %v1004_v1 = vld [vmem:[#allocation2 + $0x38] sm:$0xff]   ;;  %v1005_v2 = vld [vmem:[#allocation2 + $0x30] sm:$0xff]   ;;  %v96_v18 = vlaneseq }
  0x26   :  { %896 = vmatprep.subr.bf16.mxu0 %v1143_v0  ;;  %912 = vmatprep.mubr.msk.bf16.mxu0 %vm1144_vm0, %v1143_v0  ;;  %v1006_v3 = vld [vmem:[#allocation2 + $0x28] sm:$0xff]   ;;  %v1007_v4 = vld [vmem:[#allocation2 + $0x20] sm:$0xff]   ;;  %v1008_v5 = vld [vmem:[#allocation2 + $0x18] sm:$0xff]   ;;  %s1145_s30 = smov [#allocation8]  }
  0x27   :  { %916 = vmatprep.subr.bf16.mxu1 %v1143_v0  ;;  %932 = vmatprep.mubr.msk.bf16.mxu1 %vm1144_vm0, %v1143_v0  ;;  %v1009_v6 = vld [vmem:[#allocation2 + $0x10] sm:$0xff]   ;;  %v1010_v7 = vld [vmem:[#allocation2 + $0x8] sm:$0xff]   ;;  %v1011_v8 = vld [vmem:[#allocation2] sm:$0xff]   ;;  %v1232_v19 = vshrl.u32 %v96_v18, 7  ;;  %s800_s10 = sshll.u32 %s1145_s30, 4  ;;  %s801_s10 = int_to_ptr.vmem [resolvable:$true] %s800_s10 }
  0x28   :  { %897 = vmatpush3.bf16.msra.mxu0 %v1004_v1  ;;  %v79_v9 = vld [vmem:[%s1306_s0] sm:$0xf]  ;;  %v1012_v10 = vld [vmem:[#allocation5 + $0x38] sm:$0xff]   ;;  %v1013_v11 = vld [vmem:[#allocation5 + $0x30] sm:$0xff]   ;;  %s1112_s11 = scalar_lea.vmem %s801_s10, 128  ;;  %p1117_p2 = scmp.lt.s32.totalorder %s801_s10, %s801_s10 }
  0x29   :  { %898 = vmatprep.subr.bf16.mxu0 %v1143_v0  ;;  %917 = vmatpush3.bf16.msra.mxu1 %v1012_v10  ;;  %v1014_v12 = vld [vmem:[#allocation5 + $0x28] sm:$0xff]   ;;  %v1015_v13 = vld [vmem:[#allocation5 + $0x20] sm:$0xff]   ;;  %v1016_v14 = vld [vmem:[#allocation5 + $0x18] sm:$0xff]   ;;  %v98_v20 = vsub.s32 0, %v1232_v19  ;;  %p1113_p1 = scmp.ne.s32.totalorder %s801_s10, %s1112_s11  ;;  %p1118_p3 = scmp.lt.s32.totalorder %s1112_s11, %s1112_s11 }
  0x2a   :  { %918 = vmatprep.subr.bf16.mxu1 %v1143_v0  ;;  %v1017_v15 = vld [vmem:[#allocation5 + $0x10] sm:$0xff]   ;;  %v1018_v16 = vld [vmem:[#allocation5 + $0x8] sm:$0xff]   ;;  %v1019_v17 = vld [vmem:[#allocation5] sm:$0xff]  }
  0x2b   :  { %v1238_v21 = vld [vmem:[%s1309_s3] sm:$0xf]  ;;  %v1020_v1 = vld [vmem:[#allocation5 + $0x78] sm:$0xff]   ;;  %p1119_p4 = por %p1118_p3, %p1117_p2 }
  0x2c   :  { %899 = vmatpush3.bf16.msra.mxu0 %v1005_v2  ;;  %v99_v22 = vrot.slane %v1238_v21, %v98_v20  ;;  %v1244_v23 = vld [vmem:[%s1310_s4] sm:$0xf]  ;;  %v1021_v2 = vld [vmem:[#allocation5 + $0x70] sm:$0xff]  }
  0x2d   :  { %900 = vmatprep.subr.bf16.mxu0 %v1143_v0  ;;  %919 = vmatpush3.bf16.msra.mxu1 %v1013_v11  ;;  %v193_v26 = vrot.slane %v1244_v23, %v98_v20  ;;  %v1250_v53 = vld [vmem:[%s1311_s5] sm:$0xf]  ;;  %p1120_p5 = pnand %p1119_p4, %p1113_p1 }
  0x2e   :  { %920 = vmatprep.subr.bf16.mxu1 %v1143_v0  ;;  %v1256_v56 = vld [vmem:[%s1312_s6] sm:$0xf] }
  0x30   :  { %901 = vmatpush3.bf16.msra.mxu0 %v1006_v3  ;;  %v1022_v3 = vld [vmem:[#allocation5 + $0x68] sm:$0xff]  }
  0x31   :  { %902 = vmatprep.subr.bf16.mxu0 %v1143_v0  ;;  %921 = vmatpush3.bf16.msra.mxu1 %v1014_v12 }
  0x32   :  { %922 = vmatprep.subr.bf16.mxu1 %v1143_v0 }
  0x34   :  { %903 = vmatpush3.bf16.msra.mxu0 %v1007_v4  ;;  %v1023_v4 = vld [vmem:[#allocation5 + $0x60] sm:$0xff]  }
  0x35   :  { %904 = vmatprep.subr.bf16.mxu0 %v1143_v0  ;;  %923 = vmatpush3.bf16.msra.mxu1 %v1015_v13 }
  0x36   :  { %924 = vmatprep.subr.bf16.mxu1 %v1143_v0 }
  0x38   :  { %905 = vmatpush3.bf16.msra.mxu0 %v1008_v5  ;;  %v1024_v5 = vld [vmem:[#allocation5 + $0x58] sm:$0xff]  }
  0x39   :  { %906 = vmatprep.subr.bf16.mxu0 %v1143_v0  ;;  %925 = vmatpush3.bf16.msra.mxu1 %v1016_v14 }
  0x3a   :  { %926 = vmatprep.subr.bf16.mxu1 %v1143_v0 }
  0x3c   :  { %907 = vmatpush3.bf16.msra.mxu0 %v1009_v6  ;;  %v1025_v6 = vld [vmem:[#allocation5 + $0x50] sm:$0xff]  }
  0x3d   :  { %908 = vmatprep.subr.bf16.mxu0 %v1143_v0  ;;  %927 = vmatpush3.bf16.msra.mxu1 %v1017_v15 }
  0x3e   :  { %928 = vmatprep.subr.bf16.mxu1 %v1143_v0 }
  0x40   :  { %909 = vmatpush3.bf16.msra.mxu0 %v1010_v7  ;;  %v1026_v7 = vld [vmem:[#allocation5 + $0x48] sm:$0xff]  }
  0x41   :  { %910 = vmatprep.subr.bf16.mxu0 %v1143_v0  ;;  %929 = vmatpush3.bf16.msra.mxu1 %v1018_v16 }
  0x42   :  { %930 = vmatprep.subr.bf16.mxu1 %v1143_v0 }
  0x44   :  { %911 = vmatpush3.bf16.msra.mxu0 %v1011_v8  ;;  %v1027_v8 = vld [vmem:[#allocation5 + $0x40] sm:$0xff]  }
  0x45   :  { %936 = vmatprep.subr.bf16.mxu0 %v1143_v0  ;;  %931 = vmatpush3.bf16.msra.mxu1 %v1019_v17 }
  0x46   :  { %956 = vmatprep.subr.bf16.mxu1 %v1143_v0 }
  0x47   :  { %913 = vmatmul.mubr.bf16.vlgmr.msra.gmra.mxu0 %v79_v9  ;;  %v248_v9 = vsub.s32 1, %v1232_v19 }
  0x48   :  { %952 = vmatprep.mubr.msk.bf16.mxu0 %vm1144_vm0, %v1143_v0  ;;  %937 = vmatpush3.bf16.msra.mxu0 %v1020_v1 }
  0x49   :  { %938 = vmatprep.subr.bf16.mxu0 %v1143_v0  ;;  %v249_v10 = vrot.slane %v1238_v21, %v248_v9  ;;  %v343_v13 = vrot.slane %v1244_v23, %v248_v9 }
  0x4c   :  { %939 = vmatpush3.bf16.msra.mxu0 %v1021_v2 }
  0x4d   :  { %940 = vmatprep.subr.bf16.mxu0 %v1143_v0 }
  0x50   :  { %941 = vmatpush3.bf16.msra.mxu0 %v1022_v3 }
  0x51   :  { %942 = vmatprep.subr.bf16.mxu0 %v1143_v0 }
  0x54   :  { %943 = vmatpush3.bf16.msra.mxu0 %v1023_v4 }
  0x55   :  { %944 = vmatprep.subr.bf16.mxu0 %v1143_v0 }
  0x58   :  { %945 = vmatpush3.bf16.msra.mxu0 %v1024_v5 }
  0x59   :  { %946 = vmatprep.subr.bf16.mxu0 %v1143_v0 }
  0x5c   :  { %947 = vmatpush3.bf16.msra.mxu0 %v1025_v6 }
  0x5d   :  { %948 = vmatprep.subr.bf16.mxu0 %v1143_v0 }
  0x60   :  { %949 = vmatpush3.bf16.msra.mxu0 %v1026_v7 }
  0x61   :  { %950 = vmatprep.subr.bf16.mxu0 %v1143_v0 }
  0x64   :  { %951 = vmatpush3.bf16.msra.mxu0 %v1027_v8 }
  0x65   :  { %976 = vmatprep.subr.bf16.mxu0 %v1143_v0 }
 0x107   :  { %v182_v24 = vpop.f32.mrf.mxu0 }
 0x108   :  { %v183_v25 = vadd.f32 %v182_v24, %v99_v22 }
 0x109   :  { %v914_v27 = vpop.f32.mrf.mxu0 }
 0x10a   :  { %v189_v28 = vmin.f32 %v183_v25, 0.0  ;;  %v188_v30 = vmax.f32 %v183_v25, 0.0 }
 0x10b   :  { %v185_v29 = vpop.f32.mrf.mxu0 }
 0x10c   :  { %v194_v31 = vmul.f32 %v193_v26, %v189_v28 }
 0x10d   :  { %v915_v32 = vpop.f32.mrf.mxu0 }
 0x10e   :  { %v195_v33 = vadd.f32 %v194_v31, %v188_v30 }
 0x110   :  { %v196_v34 = vrot.slane %v195_v33, 4  ;;  %v202_v35 = vmul.f32 %v195_v33, %v195_v33 }
 0x112   :  { %v197_v36 = vadd.f32 %v196_v34, %v195_v33  ;;  %v203_v37 = vrot.slane %v202_v35, 4 }
 0x114   :  { %v198_v38 = vrot.slane %v197_v36, 2  ;;  %v204_v39 = vadd.f32 %v203_v37, %v202_v35 }
 0x116   :  { %v199_v40 = vadd.f32 %v198_v38, %v197_v36  ;;  %v205_v41 = vrot.slane %v204_v39, 2 }
 0x118   :  { %v206_v42 = vadd.f32 %v205_v41, %v204_v39  ;;  %v200_v43 = vrot.slane %v199_v40, 1 }
 0x11a   :  { %v207_v44 = vrot.slane %v206_v42, 1  ;;  %v201_v45 = vadd.f32 %v200_v43, %v199_v40 }
 0x11c   :  { %v208_v46 = vadd.f32 %v207_v44, %v206_v42  ;;  %v209_v47 = vmul.f32 0.125, %v201_v45 }
 0x11e   :  { %v210_v48 = vmul.f32 0.125, %v208_v46  ;;  %v211_v49 = vmul.f32 %v209_v47, %v209_v47 }
 0x120   :  { %v212_v50 = vsub.f32 %v210_v48, %v211_v49 }
 0x122   :  { %v213_v51 = vmax.f32 %v212_v50, 0.0 }
 0x124   :  { %v214_v52 = vadd.f32 1e-05, %v213_v51 }
 0x126   :  { %1044 = vrsqrt.f32 %v214_v52  ;;  %v1028_v52 = vld [vmem:[#allocation5 + $0xb8] sm:$0xff]  }
 0x133   :  { %v1045_v54 = vpop.eup %1044 }
 0x134   :  { %v216_v55 = vmul.f32 %v1045_v54, %v1250_v53  ;;  %v1029_v54 = vld [vmem:[#allocation5 + $0xb0] sm:$0xff]  }
 0x136   :  { %v217_v57 = vmul.f32 %v216_v55, %v209_v47  ;;  %v222_v58 = vrot.slane %v216_v55, %v98_v20  ;;  %v1030_v55 = vld [vmem:[#allocation5 + $0xa8] sm:$0xff]  }
 0x138   :  { %v218_v59 = vsub.f32 %v1256_v56, %v217_v57  ;;  %v223_v60 = vmul.f32 %v222_v58, %v195_v33  ;;  %v1031_v57 = vld [vmem:[#allocation5 + $0xa0] sm:$0xff]   ;;  %v1032_v58 = vld [vmem:[#allocation5 + $0x98] sm:$0xff]  }
 0x13a   :  { %v227_v61 = vrot.slane %v218_v59, %v98_v20  ;;  %v1033_v59 = vld [vmem:[#allocation5 + $0x90] sm:$0xff]  }
 0x13c   :  { %v228_v62 = vadd.f32 %v227_v61, %v223_v60  ;;  %v1034_v60 = vld [vmem:[#allocation5 + $0x88] sm:$0xff]   ;;  %v1035_v61 = vld [vmem:[#allocation5 + $0x80] sm:$0xff]  }
 0x13e   :  { %v245_v63 = vpack.c.bf16 %v228_v62, %v228_v62  ;;  %v399_v62 = vsub.s32 2, %v1232_v19 }
 0x140   :  { %933 = vmatmul.mubr.bf16.vlgmr.msra.gmra.mxu1 %v245_v63  ;;  %v400_v63 = vrot.slane %v1238_v21, %v399_v62  ;;  %v494_v3 = vrot.slane %v1244_v23, %v399_v62 }
 0x141   :  { %972 = vmatprep.mubr.msk.bf16.mxu1 %vm1144_vm0, %v1143_v0  ;;  %957 = vmatpush3.bf16.msra.mxu1 %v1028_v52 }
 0x142   :  { %958 = vmatprep.subr.bf16.mxu1 %v1143_v0 }
 0x145   :  { %959 = vmatpush3.bf16.msra.mxu1 %v1029_v54 }
 0x146   :  { %960 = vmatprep.subr.bf16.mxu1 %v1143_v0 }
 0x149   :  { %961 = vmatpush3.bf16.msra.mxu1 %v1030_v55 }
 0x14a   :  { %962 = vmatprep.subr.bf16.mxu1 %v1143_v0 }
 0x14d   :  { %963 = vmatpush3.bf16.msra.mxu1 %v1031_v57 }
 0x14e   :  { %964 = vmatprep.subr.bf16.mxu1 %v1143_v0 }
 0x151   :  { %965 = vmatpush3.bf16.msra.mxu1 %v1032_v58 }
 0x152   :  { %966 = vmatprep.subr.bf16.mxu1 %v1143_v0 }
 0x155   :  { %967 = vmatpush3.bf16.msra.mxu1 %v1033_v59 }
 0x156   :  { %968 = vmatprep.subr.bf16.mxu1 %v1143_v0 }
 0x159   :  { %969 = vmatpush3.bf16.msra.mxu1 %v1034_v60 }
 0x15a   :  { %970 = vmatprep.subr.bf16.mxu1 %v1143_v0 }
 0x15d   :  { %971 = vmatpush3.bf16.msra.mxu1 %v1035_v61 }
 0x200   :  { %v332_v11 = vpop.f32.mrf.mxu1 }
 0x201   :  { %v333_v12 = vadd.f32 %v332_v11, %v249_v10 }
 0x202   :  { %v934_v14 = vpop.f32.mrf.mxu1 }
 0x203   :  { %v339_v15 = vmin.f32 %v333_v12, 0.0  ;;  %v338_v17 = vmax.f32 %v333_v12, 0.0 }
 0x204   :  { %v335_v16 = vpop.f32.mrf.mxu1 }
 0x205   :  { %v344_v18 = vmul.f32 %v343_v13, %v339_v15 }
 0x206   :  { %v935_v20 = vpop.f32.mrf.mxu1 }
 0x207   :  { %v345_v22 = vadd.f32 %v344_v18, %v338_v17 }
 0x209   :  { %v346_v24 = vrot.slane %v345_v22, 4  ;;  %v352_v25 = vmul.f32 %v345_v22, %v345_v22 }
 0x20b   :  { %v347_v26 = vadd.f32 %v346_v24, %v345_v22  ;;  %v353_v27 = vrot.slane %v352_v25, 4 }
 0x20d   :  { %v348_v28 = vrot.slane %v347_v26, 2  ;;  %v354_v29 = vadd.f32 %v353_v27, %v352_v25 }
 0x20f   :  { %v349_v30 = vadd.f32 %v348_v28, %v347_v26  ;;  %v355_v31 = vrot.slane %v354_v29, 2 }
 0x211   :  { %v350_v32 = vrot.slane %v349_v30, 1  ;;  %v356_v33 = vadd.f32 %v355_v31, %v354_v29 }
 0x213   :  { %v357_v34 = vrot.slane %v356_v33, 1  ;;  %v351_v35 = vadd.f32 %v350_v32, %v349_v30 }
 0x215   :  { %v358_v36 = vadd.f32 %v357_v34, %v356_v33  ;;  %v359_v37 = vmul.f32 0.125, %v351_v35 }
 0x217   :  { %v360_v38 = vmul.f32 0.125, %v358_v36  ;;  %v361_v39 = vmul.f32 %v359_v37, %v359_v37 }
 0x219   :  { %v362_v40 = vsub.f32 %v360_v38, %v361_v39 }
 0x21b   :  { %v363_v41 = vmax.f32 %v362_v40, 0.0 }
 0x21d   :  { %v364_v42 = vadd.f32 1e-05, %v363_v41 }
 0x21f   :  { %1046 = vrsqrt.f32 %v364_v42  ;;  %v1036_v42 = vld [vmem:[#allocation7 + $0x38] sm:$0xff]  }
 0x22c   :  { %v1047_v43 = vpop.eup %1046 }
 0x22d   :  { %v366_v44 = vmul.f32 %v1047_v43, %v1250_v53  ;;  %v1037_v43 = vld [vmem:[#allocation7 + $0x30] sm:$0xff]  }
 0x22f   :  { %v367_v45 = vmul.f32 %v366_v44, %v359_v37  ;;  %v372_v46 = vrot.slane %v366_v44, %v248_v9  ;;  %v1038_v44 = vld [vmem:[#allocation7 + $0x28] sm:$0xff]  }
 0x231   :  { %v368_v47 = vsub.f32 %v1256_v56, %v367_v45  ;;  %v373_v48 = vmul.f32 %v372_v46, %v345_v22  ;;  %v1039_v45 = vld [vmem:[#allocation7 + $0x20] sm:$0xff]   ;;  %v1040_v46 = vld [vmem:[#allocation7 + $0x18] sm:$0xff]  }
 0x233   :  { %v377_v49 = vrot.slane %v368_v47, %v248_v9  ;;  %v1041_v47 = vld [vmem:[#allocation7 + $0x10] sm:$0xff]  }
 0x235   :  { %v378_v50 = vadd.f32 %v377_v49, %v373_v48  ;;  %v1042_v48 = vld [vmem:[#allocation7 + $0x8] sm:$0xff]   ;;  %v1043_v49 = vld [vmem:[#allocation7] sm:$0xff]  }
 0x237   :  { %v396_v51 = vpack.c.bf16 %v378_v50, %v378_v50  ;;  %v550_v50 = vsub.s32 3, %v1232_v19 }
 0x239   :  { %953 = vmatmul.mubr.bf16.vlgmr.msra.gmra.mxu0 %v396_v51  ;;  %v551_v51 = vrot.slane %v1238_v21, %v550_v50  ;;  %v645_v55 = vrot.slane %v1244_v23, %v550_v50 }
 0x23a   :  { %992 = vmatprep.mubr.msk.bf16.mxu0 %vm1144_vm0, %v1143_v0  ;;  %977 = vmatpush3.bf16.msra.mxu0 %v1036_v42 }
 0x23b   :  { %978 = vmatprep.subr.bf16.mxu0 %v1143_v0 }
 0x23e   :  { %979 = vmatpush3.bf16.msra.mxu0 %v1037_v43 }
 0x23f   :  { %980 = vmatprep.subr.bf16.mxu0 %v1143_v0 }
 0x242   :  { %981 = vmatpush3.bf16.msra.mxu0 %v1038_v44 }
 0x243   :  { %982 = vmatprep.subr.bf16.mxu0 %v1143_v0 }
 0x246   :  { %983 = vmatpush3.bf16.msra.mxu0 %v1039_v45 }
 0x247   :  { %984 = vmatprep.subr.bf16.mxu0 %v1143_v0 }
 0x24a   :  { %985 = vmatpush3.bf16.msra.mxu0 %v1040_v46 }
 0x24b   :  { %986 = vmatprep.subr.bf16.mxu0 %v1143_v0 }
 0x24e   :  { %987 = vmatpush3.bf16.msra.mxu0 %v1041_v47 }
 0x24f   :  { %988 = vmatprep.subr.bf16.mxu0 %v1143_v0 }
 0x252   :  { %989 = vmatpush3.bf16.msra.mxu0 %v1042_v48 }
 0x253   :  { %990 = vmatprep.subr.bf16.mxu0 %v1143_v0 }
 0x256   :  { %991 = vmatpush3.bf16.msra.mxu0 %v1043_v49 }
 0x2f9   :  { %v483_v1 = vpop.f32.mrf.mxu0 }
 0x2fa   :  { %v484_v2 = vadd.f32 %v483_v1, %v400_v63 }
 0x2fb   :  { %v954_v4 = vpop.f32.mrf.mxu0 }
 0x2fc   :  { %v490_v5 = vmin.f32 %v484_v2, 0.0  ;;  %v489_v7 = vmax.f32 %v484_v2, 0.0 }
 0x2fd   :  { %v486_v6 = vpop.f32.mrf.mxu0 }
 0x2fe   :  { %v495_v8 = vmul.f32 %v494_v3, %v490_v5 }
 0x2ff   :  { %v955_v9 = vpop.f32.mrf.mxu0 }
 0x300   :  { %v496_v10 = vadd.f32 %v495_v8, %v489_v7 }
 0x302   :  { %v497_v11 = vrot.slane %v496_v10, 4  ;;  %v503_v12 = vmul.f32 %v496_v10, %v496_v10 }
 0x304   :  { %v498_v13 = vadd.f32 %v497_v11, %v496_v10  ;;  %v504_v14 = vrot.slane %v503_v12, 4 }
 0x306   :  { %v499_v15 = vrot.slane %v498_v13, 2  ;;  %v505_v16 = vadd.f32 %v504_v14, %v503_v12 }
 0x308   :  { %v500_v17 = vadd.f32 %v499_v15, %v498_v13  ;;  %v506_v18 = vrot.slane %v505_v16, 2 }
 0x30a   :  { %v501_v20 = vrot.slane %v500_v17, 1  ;;  %v507_v22 = vadd.f32 %v506_v18, %v505_v16 }
 0x30c   :  { %v508_v24 = vrot.slane %v507_v22, 1  ;;  %v502_v25 = vadd.f32 %v501_v20, %v500_v17 }
 0x30e   :  { %v509_v26 = vadd.f32 %v508_v24, %v507_v22  ;;  %v510_v27 = vmul.f32 0.125, %v502_v25 }
 0x310   :  { %v511_v28 = vmul.f32 0.125, %v509_v26  ;;  %v512_v29 = vmul.f32 %v510_v27, %v510_v27 }
 0x312   :  { %v513_v30 = vsub.f32 %v511_v28, %v512_v29  ;;  %v842_v28 = vld [vmem:[%s1314_s8] ss:$0 sm:$0xff] }
 0x314   :  { %v514_v31 = vmax.f32 %v513_v30, 0.0 }
 0x316   :  { %v515_v32 = vadd.f32 1e-05, %v514_v31 }
 0x318   :  { %1048 = vrsqrt.f32 %v515_v32 }
 0x325   :  { %v1049_v33 = vpop.eup %1048 }
 0x326   :  { %v517_v34 = vmul.f32 %v1049_v33, %v1250_v53 }
 0x328   :  { %v518_v35 = vmul.f32 %v517_v34, %v510_v27  ;;  %v523_v36 = vrot.slane %v517_v34, %v399_v62 }
 0x32a   :  { %v519_v37 = vsub.f32 %v1256_v56, %v518_v35  ;;  %v524_v38 = vmul.f32 %v523_v36, %v496_v10 }
 0x32c   :  { %v528_v39 = vrot.slane %v519_v37, %v399_v62 }
 0x32e   :  { %v529_v40 = vadd.f32 %v528_v39, %v524_v38 }
 0x330   :  { %v547_v41 = vpack.c.bf16 %v529_v40, %v529_v40 }
 0x332   :  { %973 = vmatmul.mubr.bf16.vlgmr.msra.gmra.mxu1 %v547_v41 }
 0x3f2   :  { %v634_v52 = vpop.f32.mrf.mxu1 }
 0x3f3   :  { %v635_v54 = vadd.f32 %v634_v52, %v551_v51 }
 0x3f4   :  { %v974_v57 = vpop.f32.mrf.mxu1 }
 0x3f5   :  { %v641_v58 = vmin.f32 %v635_v54, 0.0  ;;  %v640_v60 = vmax.f32 %v635_v54, 0.0 }
 0x3f6   :  { %v637_v59 = vpop.f32.mrf.mxu1 }
 0x3f7   :  { %v646_v61 = vmul.f32 %v645_v55, %v641_v58 }
 0x3f8   :  { %v975_v62 = vpop.f32.mrf.mxu1 }
 0x3f9   :  { %v647_v63 = vadd.f32 %v646_v61, %v640_v60 }
 0x3fb   :  { %v648_v1 = vrot.slane %v647_v63, 4  ;;  %v654_v2 = vmul.f32 %v647_v63, %v647_v63 }
 0x3fd   :  { %v649_v3 = vadd.f32 %v648_v1, %v647_v63  ;;  %v655_v0 = vrot.slane %v654_v2, 4 }
 0x3ff   :  { %v650_v4 = vrot.slane %v649_v3, 2  ;;  %v656_v5 = vadd.f32 %v655_v0, %v654_v2 }
 0x401   :  { %v651_v19 = vadd.f32 %v650_v4, %v649_v3  ;;  %v657_v6 = vrot.slane %v656_v5, 2 }
 0x403   :  { %v652_v21 = vrot.slane %v651_v19, 1  ;;  %v658_v7 = vadd.f32 %v657_v6, %v656_v5 }
 0x405   :  { %v659_v8 = vrot.slane %v658_v7, 1  ;;  %v653_v9 = vadd.f32 %v652_v21, %v651_v19 }
 0x407   :  { %v660_v23 = vadd.f32 %v659_v8, %v658_v7  ;;  %v661_v10 = vmul.f32 0.125, %v653_v9 }
 0x409   :  { %v662_v11 = vmul.f32 0.125, %v660_v23  ;;  %v663_v12 = vmul.f32 %v661_v10, %v661_v10 }
 0x40b   :  { %v664_v13 = vsub.f32 %v662_v11, %v663_v12 }
 0x40d   :  { %v665_v14 = vmax.f32 %v664_v13, 0.0 }
 0x40f   :  { %v666_v15 = vadd.f32 1e-05, %v665_v14 }
 0x411   :  { %1050 = vrsqrt.f32 %v666_v15 }
 0x41e   :  { %v1051_v16 = vpop.eup %1050 }
 0x41f   :  { %v668_v17 = vmul.f32 %v1051_v16, %v1250_v53 }
 0x421   :  { %v669_v18 = vmul.f32 %v668_v17, %v661_v10  ;;  %v674_v20 = vrot.slane %v668_v17, %v550_v50 }
 0x423   :  { %v670_v22 = vsub.f32 %v1256_v56, %v669_v18  ;;  %v675_v24 = vmul.f32 %v674_v20, %v647_v63 }
 0x425   :  { %v679_v25 = vrot.slane %v670_v22, %v550_v50 }
 0x427   :  { %v680_v26 = vadd.f32 %v679_v25, %v675_v24 }
 0x429   :  { %v681_v27 = vpack.c.bf16 %v680_v26, %v680_v26 }
 0x42b   :  { %993 = vmatmul.mubr.bf16.vlgmr.msra.gmra.mxu0 %v681_v27 }
 0x4eb   :  { %v787_v29 = vpop.f32.mrf.mxu0 }
 0x4ec   :  { %v788_v30 = vadd.f32 %v842_v28, %v787_v29 }
 0x4ed   :  { %v994_v31 = vpop.f32.mrf.mxu0 }
 0x4ee   :  { %793 = vst [vmem:[#allocation8] sm:$0xff] %v788_v30 }
 0x4ef   :  { %v790_v53 = vpop.f32.mrf.mxu0 }
 0x4f0   :  { %1123 = shalt.err (!%p1120_p5)
}
 0x4f1   :  { %803 = dma.vmem_to_hbm [thread:$0]  %s801_s10, 128, %s1315_s9, [#allocation4]   ;;  %v995_v56 = vpop.f32.mrf.mxu0 }
 0x4f2   :  { %1136 = dma.done.wait [#allocation4], 128  }
 0x4f3   :  { %1137 = vsyncadd [#allocation4], 4294967168 }
 0x4f4   :  { %807 = vsyncpa [#allocation3], 1 }
 0x4f5   :  { %808 = vsyncpa [#allocation6], 1 }
 0x4f6   :  { %809 = vsyncpa [#allocation4], 1 }

</bundles_post_ra>
